<compile_context>
chip_gen: v7x
topology: tpu7x:2x2x1
jax: 0.10.0
libtpu: 0.0.40
codegen_flags: <defaults>
</compile_context>

<pallas_src>
import jax
import jax.numpy as jnp
from jax.experimental import pallas as pl
from jax.experimental.pallas import tpu as pltpu


# ----------------------------------------------------------------------------
# Helpers
# ----------------------------------------------------------------------------
def _round_up(x, m):
    return ((x + m - 1) // m) * m


def _cdiv(a, b):
    return (a + b - 1) // b


# ----------------------------------------------------------------------------
# Kernel: out = x @ W_t + b, grid = (M/tm, N/tn, K/tk), K is the reduction.
# The output block index_map returns the same (i, j) block for every k, so it
# stays resident in VMEM across the whole K loop -> accumulate directly into
# o_ref (no scratch accumulator, no finalize copy).
# ----------------------------------------------------------------------------
def _linear_kernel(x_ref, w_ref, b_ref, o_ref):
    k = pl.program_id(2)

    @pl.when(k == 0)
    def _init():
        # Bias broadcast straight into the resident output tile: added exactly
        # once, no zeros+add VPU pass.
        o_ref[...] = jnp.broadcast_to(b_ref[...], o_ref.shape).astype(o_ref.dtype)

    if w_ref.dtype == jnp.bfloat16:
        # bf16 fast path: cast the activation tile, keep f32 accumulation.
        x = x_ref[...].astype(jnp.bfloat16)
        prec = None
    else:
        # Strict f32 parity with PyTorch nn.Linear.
        x = x_ref[...]
        prec = jax.lax.Precision.HIGHEST

    o_ref[...] += jnp.dot(x, w_ref[...], precision=prec,
                          preferred_element_type=jnp.float32)


# ----------------------------------------------------------------------------
# Tiling / padding policy (shared by param prep and the wrapper)
# ----------------------------------------------------------------------------
def _tiles(in_features, out_features):
    """Returns (tk, tn, k_pad, n_pad) for a given Linear layer."""
    K, N = in_features, out_features

    # K (contraction): keep the full extent while it comfortably fits VMEM;
    # otherwise 512-wide chunks with zero padding (zeros add nothing).
    if K <= 2048:
        tk, k_pad = K, K
    else:
        tk = 512
        k_pad = _round_up(K, tk)

    # N (lanes): lane-dense (multiple of 128) so stores are unmasked full-lane
    # vst.  Never let tn drop below 256 when N is large: prefer a bit more
    # padding over 128-wide tiles that under-fill the 256-wide MXU and
    # multiply grid steps.
    n128 = _round_up(N, 128)
    if n128 <= 512:
        tn, n_pad = n128, n128
    else:
        tn = 512
        n_pad = _round_up(N, 512)
        if n_pad - N > 256:          # too much waste at tn=512 -> use tn=256
            tn = 256
            n_pad = _round_up(N, 256)
    return tk, tn, k_pad, n_pad


def _prepare_linear_params(weight, bias, weight_dtype=jnp.float32):
    """PyTorch-convention (out, in) weight + (out,) bias -> kernel-ready
    (k_pad, n_pad) transposed weight and (1, n_pad) f32 bias.  Done once."""
    out_f, in_f = weight.shape
    _, _, k_pad, n_pad = _tiles(in_f, out_f)

    w_t = weight.T                                   # once, not per call
    if (k_pad, n_pad) != (in_f, out_f):
        w_t = jnp.pad(w_t, ((0, k_pad - in_f), (0, n_pad - out_f)))

    b2 = bias.reshape(1, out_f).astype(jnp.float32)  # bias stays f32 always
    if n_pad != out_f:
        b2 = jnp.pad(b2, ((0, 0), (0, n_pad - out_f)))

    return w_t.astype(weight_dtype), b2


# ----------------------------------------------------------------------------
# Wrapper
# ----------------------------------------------------------------------------
def pallas_linear(x, w_t, bias2d, in_features, out_features):
    """x: (M, in_features); w_t: (k_pad, n_pad) pre-transposed/padded weight;
    bias2d: (1, n_pad) f32.  Returns (M, out_features) = x @ W.T + b."""
    M, K = x.shape
    assert K == in_features
    tk, tn, k_pad, n_pad = _tiles(in_features, out_features)

    # M tiling: cap at 512 rows (halves weight re-streaming vs 256 for big M),
    # and pick tm so m_pad stays within 7 rows of M instead of rounding M up
    # to a full multiple of the cap (M=264 must not become 512).
    m8 = _round_up(M, 8)
    num_m = _cdiv(m8, 512)
    tm = _round_up(_cdiv(m8, num_m), 8)
    m_pad = tm * num_m

    # v7x shards the 'parallel' grid axes across its 2 TensorCores: make sure
    # there are at least 2 parallel blocks when the shapes allow it.
    if (m_pad // tm) * (n_pad // tn) == 1:
        if tn % 256 == 0:
            tn //= 2
        elif tm % 16 == 0:
            tm //= 2

    if (m_pad, k_pad) != (M, K):
        x = jnp.pad(x, ((0, m_pad - M), (0, k_pad - K)))
    # TODO(synk): handle M/K remainders with masked edge tiles instead of a
    # wrapper-side jnp.pad to save one extra activation pass when unaligned.

    grid = (m_pad // tm, n_pad // tn, k_pad // tk)

    # Weight BlockSpec: 3-deep buffering only in the deep-K bf16 regime where
    # the small per-k-step weight tile can leave the default 2-deep pipeline
    # unable to hide the DMA.
    w_spec_kwargs = {}
    if w_t.dtype == jnp.bfloat16 and grid[2] > 2:
        w_spec_kwargs["pipeline_mode"] = pl.Buffered(3)
    w_spec = pl.BlockSpec((tk, tn), lambda i, j, k: (k, j), **w_spec_kwargs)

    out = pl.pallas_call(
        _linear_kernel,
        out_shape=jax.ShapeDtypeStruct((m_pad, n_pad), jnp.float32),
        grid=grid,
        in_specs=[
            pl.BlockSpec((tm, tk), lambda i, j, k: (i, k)),   # activations
            w_spec,                                           # weight
            pl.BlockSpec((1, tn), lambda i, j, k: (0, j)),    # bias
        ],
        out_specs=pl.BlockSpec((tm, tn), lambda i, j, k: (i, j)),
        compiler_params=pltpu.CompilerParams(
            # M/N shard across v7x's 2 TensorCores; K is the reduction.
            dimension_semantics=("parallel", "parallel", "arbitrary"),
            # Worst-case (tm,tn,tk)=(512,512,2048) f32 double-buffered tile set
            # is ~18 MiB; 48 MiB leaves pipelining headroom and stays inside
            # v7x's 64 MiB physical VMEM (v5e/v6e have 128 MiB).
            vmem_limit_bytes=48 * 1024 * 1024,
        ),
    )(x, w_t, bias2d)

    if (m_pad, n_pad) != (M, out_features):
        out = out[:M, :out_features]
    return out


# ----------------------------------------------------------------------------
# Module
# ----------------------------------------------------------------------------
class LinearModule:
    """JAX/Pallas equivalent of the PyTorch `Linear` module.

    use_bf16_weights=True stores the fc weights as bf16 (f32 accumulation) for
    ~2x weight HBM bandwidth and native MXU rate; keep False (default) for
    strict f32 PyTorch parity.
    """

    def __init__(self, in_features, out_features, key, use_bf16_weights=False):
        k1, k2, k3, k4 = jax.random.split(key, 4)
        bound = 1.0 / (in_features ** 0.5)
        # Raw params (PyTorch nn.Linear layout) — kept for reference checks.
        self.w1 = jax.random.uniform(k1, (out_features, in_features),
                                     jnp.float32, -bound, bound)
        self.b1 = jax.random.uniform(k2, (out_features,),
                                     jnp.float32, -bound, bound)
        self.w2 = jax.random.uniform(k3, (out_features, in_features),
                                     jnp.float32, -bound, bound)
        self.b2 = jax.random.uniform(k4, (out_features,),
                                     jnp.float32, -bound, bound)

        self.in_features = in_features
        self.out_features = out_features
        wdt = jnp.bfloat16 if use_bf16_weights else jnp.float32
        # Kernel-ready params: transposed + padded (+ optional bf16) ONCE here.
        self.w1_t, self.b1_2d = _prepare_linear_params(self.w1, self.b1, wdt)
        self.w2_t, self.b2_2d = _prepare_linear_params(self.w2, self.b2, wdt)

    def __call__(self, x, y, z):
        x_out = pallas_linear(x, self.w1_t, self.b1_2d,
                              self.in_features, self.out_features)
        # y and z share fc2's weights: one stacked matmul so the fc2 weight is
        # streamed from HBM once (the concat copy is << one weight re-read in
        # the weight-bound regime this targets).
        yz = jnp.concatenate([y, z], axis=0)
        yz_out = pallas_linear(yz, self.w2_t, self.b2_2d,
                               self.in_features, self.out_features)
        by = y.shape[0]
        return (x_out, yz_out[:by], yz_out[by:])


# ----------------------------------------------------------------------------
# Self-test
# ----------------------------------------------------------------------------
def _ref_linear(inp, w, b):
    # Full-f32 reference (explicit HIGHEST so the XLA dot doesn't drop to bf16).
    return jnp.dot(inp, w.T, precision=jax.lax.Precision.HIGHEST) + b


if __name__ == "__main__":
    key = jax.random.PRNGKey(0)
    k_mod, kx, ky, kz = jax.random.split(key, 4)

    # --- small shape, strict f32 parity -------------------------------------
    in_f, out_f, batch = 32, 32, 8
    module = LinearModule(in_f, out_f, k_mod)

    x = jax.random.normal(kx, (batch, in_f), jnp.float32)
    y = jax.random.normal(ky, (batch, in_f), jnp.float32)
    z = jax.random.normal(kz, (batch, in_f), jnp.float32)

    x_out, y_out, z_out = module(x, y, z)
    jax.block_until_ready((x_out, y_out, z_out))

    assert x_out.shape == (batch, out_f)
    assert y_out.shape == (batch, out_f)
    assert z_out.shape == (batch, out_f)
    assert jnp.allclose(x_out, _ref_linear(x, module.w1, module.b1),
                        atol=1e-5, rtol=1e-5)
    assert jnp.allclose(y_out, _ref_linear(y, module.w2, module.b2),
                        atol=1e-5, rtol=1e-5)
    assert jnp.allclose(z_out, _ref_linear(z, module.w2, module.b2),
                        atol=1e-5, rtol=1e-5)

    # --- unaligned N (padding + output slice + 2-block split), strict f32 ---
    in_f2, out_f2, batch2 = 256, 200, 24
    module2 = LinearModule(in_f2, out_f2, k_mod)
    x2 = jax.random.normal(kx, (batch2, in_f2), jnp.float32)
    y2 = jax.random.normal(ky, (batch2, in_f2), jnp.float32)
    z2 = jax.random.normal(kz, (batch2, in_f2), jnp.float32)

    x2_out, y2_out, z2_out = module2(x2, y2, z2)
    jax.block_until_ready((x2_out, y2_out, z2_out))

    assert x2_out.shape == (batch2, out_f2)
    assert jnp.allclose(x2_out, _ref_linear(x2, module2.w1, module2.b1),
                        atol=1e-4, rtol=1e-5)
    assert jnp.allclose(y2_out, _ref_linear(y2, module2.w2, module2.b2),
                        atol=1e-4, rtol=1e-5)
    assert jnp.allclose(z2_out, _ref_linear(z2, module2.w2, module2.b2),
                        atol=1e-4, rtol=1e-5)

    # --- bf16-weight fast path (relaxed tolerance) ---------------------------
    module3 = LinearModule(in_f2, out_f2, k_mod, use_bf16_weights=True)
    x3_out, y3_out, z3_out = module3(x2, y2, z2)
    jax.block_until_ready((x3_out, y3_out, z3_out))
    assert jnp.allclose(x3_out, _ref_linear(x2, module3.w1, module3.b1),
                        atol=5e-2, rtol=5e-2)
    assert jnp.allclose(y3_out, _ref_linear(y2, module3.w2, module3.b2),
                        atol=5e-2, rtol=5e-2)
    assert jnp.allclose(z3_out, _ref_linear(z2, module3.w2, module3.b2),
                        atol=5e-2, rtol=5e-2)

    print("KERNEL_OK")
</pallas_src>

<mosaic_0001>
module attributes {stable_mosaic.version = 11 : i64} {
  func.func @_linear_kernel(%arg0: i32, %arg1: i32, %arg2: i32, %arg3: memref<8x32xf32, #tpu.memory_space<vmem>>, %arg4: memref<32x128xf32, #tpu.memory_space<vmem>>, %arg5: memref<1x128xf32, #tpu.memory_space<vmem>>, %arg6: memref<8x128xf32, #tpu.memory_space<vmem>>) attributes {dimension_semantics = [#tpu.dimension_semantics<parallel>, #tpu.dimension_semantics<parallel>, #tpu.dimension_semantics<arbitrary>], iteration_bounds = array<i64: 1, 1, 1>, scalar_prefetch = 0 : i64, scratch_operands = 0 : i64, tpu.core_type = #tpu.core_type<tc>, window_params = [{transform_indices = @transform_0, window_bounds = array<i64: 8, 32>}, {transform_indices = @transform_1, window_bounds = array<i64: 32, 128>}, {transform_indices = @transform_2, window_bounds = array<i64: 1, 128>}, {transform_indices = @transform_3, window_bounds = array<i64: 8, 128>}]} {
    %c0_i32 = arith.constant 0 : i32
    %0 = arith.cmpi eq, %arg2, %c0_i32 : i32
    %1 = arith.extui %0 : i1 to i32
    %c0_i32_0 = arith.constant 0 : i32
    %2 = arith.cmpi ne, %1, %c0_i32_0 : i32
    scf.if %2 {
      %c0_8 = arith.constant 0 : index
      %c0_9 = arith.constant 0 : index
      %9 = vector.load %arg5[%c0_8, %c0_9] : memref<1x128xf32, #tpu.memory_space<vmem>>, vector<1x128xf32>
      %10 = vector.shape_cast %9 : vector<1x128xf32> to vector<1x128xf32>
      %11 = vector.broadcast %10 : vector<1x128xf32> to vector<8x128xf32>
      %c0_10 = arith.constant 0 : index
      %c0_11 = arith.constant 0 : index
      %12 = vector.load %arg6[%c0_10, %c0_11] : memref<8x128xf32, #tpu.memory_space<vmem>>, vector<8x128xf32>
      tpu.vector_store %arg6[%c0_10, %c0_11], %11 {strides = array<i32>} : memref<8x128xf32, #tpu.memory_space<vmem>>, vector<8x128xf32>,
    } else {
    }
    %c0 = arith.constant 0 : index
    %c0_1 = arith.constant 0 : index
    %3 = vector.load %arg3[%c0, %c0_1] : memref<8x32xf32, #tpu.memory_space<vmem>>, vector<8x32xf32>
    %c0_2 = arith.constant 0 : index
    %c0_3 = arith.constant 0 : index
    %4 = vector.load %arg6[%c0_2, %c0_3] : memref<8x128xf32, #tpu.memory_space<vmem>>, vector<8x128xf32>
    %c0_4 = arith.constant 0 : index
    %c0_5 = arith.constant 0 : index
    %5 = vector.load %arg4[%c0_4, %c0_5] : memref<32x128xf32, #tpu.memory_space<vmem>>, vector<32x128xf32>
    %cst = arith.constant dense<0.000000e+00> : vector<8x128xf32>
    %6 = tpu.matmul %3, %5, %cst {dimension_numbers = #tpu.dot_dimension_numbers<[1], [0], [0], [1], [0, 0, 1, 1], [], []>, precision = #tpu.contract_precision<fp32>} : vector<8x32xf32>, vector<32x128xf32>, vector<8x128xf32> -> vector<8x128xf32>
    %7 = arith.addf %4, %6 : vector<8x128xf32>
    %c0_6 = arith.constant 0 : index
    %c0_7 = arith.constant 0 : index
    %8 = vector.load %arg6[%c0_6, %c0_7] : memref<8x128xf32, #tpu.memory_space<vmem>>, vector<8x128xf32>
    tpu.vector_store %arg6[%c0_6, %c0_7], %7 {strides = array<i32>} : memref<8x128xf32, #tpu.memory_space<vmem>>, vector<8x128xf32>,
    return
  }
  func.func @transform_0(%arg0: i32, %arg1: i32, %arg2: i32) -> (i32, i32) {
    %c0_i32 = arith.constant 0 : i32
    return %arg0, %arg2 : i32, i32
  }
  func.func @transform_1(%arg0: i32, %arg1: i32, %arg2: i32) -> (i32, i32) {
    %c0_i32 = arith.constant 0 : i32
    return %arg2, %arg1 : i32, i32
  }
  func.func @transform_2(%arg0: i32, %arg1: i32, %arg2: i32) -> (i32, i32) {
    %c0_i32 = arith.constant 0 : i32
    %c0_i32_0 = arith.constant 0 : i32
    return %c0_i32, %arg1 : i32, i32
  }
  func.func @transform_3(%arg0: i32, %arg1: i32, %arg2: i32) -> (i32, i32) {
    %c0_i32 = arith.constant 0 : i32
    return %arg0, %arg1 : i32, i32
  }
}

</mosaic_0001>

<bundles_post_ra>
// kernel: tpu_custom_call.1
= control target key start
LH: loop header
LB: loop body
LE: loop exit
PB: predicated region body
PF: predicated region fallthrough
CT: control target
= control target key end

     0   :  { %8 = vsyncpa [#allocation3], 0  ;;  %s877_s0 = inlined_call_operand.hbm [shape: f32[8,32], index: 0, kind: input, shape index: {}]   ;;  %s878_s1 = inlined_call_operand.hbm [shape: f32[32,128], index: 1, kind: input, shape index: {}]   ;;  %s879_s2 = inlined_call_operand.vmem [shape: f32[1,128], index: 2, kind: input, shape index: {}]   ;;  %s880_s3 = inlined_call_operand.hbm [shape: f32[8,128], index: 3, kind: output, shape index: {}]  }
   0x1   :  { %9 = vsyncpa [#allocation6], 0 }
   0x2   :  { %10 = vsyncpa [#allocation4], 0  ;;  %s779_s12 = smov [#allocation2]   ;;  %s780_s14 = smov [#allocation5]  }
   0x3   :  { %s17_s13 = sshll.u32 %s779_s12, 4  ;;  %s26_s15 = sshll.u32 %s780_s14, 4  ;;  %s18_s13 = int_to_ptr.vmem [resolvable:$true] %s17_s13  ;;  %s807_s15 = int_to_ptr.vmem [resolvable:$true] %s26_s15 }
   0x4   :  { %s707_s18 = scalar_lea.hbm %s877_s0, 128 }
   0x5   :  { %p708_p0 = scmp.ne.s32.totalorder %s877_s0, %s707_s18  ;;  %p711_p1 = scmp.lt.u32.totalorder %s707_s18, %s877_s0 }
   0x7   :  { %p713_p2 = pnand %p711_p1, %p708_p0 }
   0x9   :  { %716 = shalt.err (!%p713_p2)
}
   0xa   :  { %s717_s23 = scalar_lea.vmem %s18_s13, 128  ;;  %p722_p4 = scmp.lt.s32.totalorder %s18_s13, %s18_s13 }
   0xb   :  { %p718_p3 = scmp.ne.s32.totalorder %s18_s13, %s717_s23  ;;  %p723_p5 = scmp.lt.s32.totalorder %s717_s23, %s717_s23 }
   0xd   :  { %p724_p6 = por %p723_p5, %p722_p4 }
   0xf   :  { %p725_p7 = pnand %p724_p6, %p718_p3 }
  0x11   :  { %728 = shalt.err (!%p725_p7)
}
  0x12   :  { %20 = dma.hbm_to_vmem [thread:$0]  %s877_s0, 128, %s18_s13, [#allocation3]  }
  0x13   :  { %s729_s28 = scalar_lea.hbm %s878_s1, 512 }
  0x14   :  { %p730_p8 = scmp.ne.s32.totalorder %s878_s1, %s729_s28  ;;  %p733_p9 = scmp.lt.u32.totalorder %s729_s28, %s878_s1 }
  0x16   :  { %p735_p10 = pnand %p733_p9, %p730_p8 }
  0x18   :  { %738 = shalt.err (!%p735_p10)
}
  0x19   :  { %s739_s6 = scalar_lea.vmem %s807_s15, 512  ;;  %p744_p12 = scmp.lt.s32.totalorder %s807_s15, %s807_s15 }
  0x1a   :  { %p740_p11 = scmp.ne.s32.totalorder %s807_s15, %s739_s6  ;;  %p745_p13 = scmp.lt.s32.totalorder %s739_s6, %s739_s6 }
  0x1c   :  { %p746_p0 = por %p745_p13, %p744_p12 }
  0x1e   :  { %p747_p1 = pnand %p746_p0, %p740_p11 }
  0x20   :  { %750 = shalt.err (!%p747_p1)
}
  0x21   :  { %s781_s0 = smov 128   ;;  %s782_s7 = smov 8  }
  0x22   :  { %32 = dma.hbm_to_vmem [thread:$0]  %s878_s1, 512, %s807_s15, [#allocation6], %s781_s0, %s781_s0, %s782_s7  }
  0x23   :  { %773 = dma.done.wait [#allocation3], 128  }
  0x24   :  { %774 = vsyncadd [#allocation3], 4294967168 }
  0x25   :  { %775 = dma.done.wait [#allocation6], 512  }
  0x26   :  { %776 = vsyncadd [#allocation6], 4294966784  ;;  %v783_v0 = vmov 0.0|0.0   ;;  %vm784_vm0 = vmmov 0   ;;  %v785_v1 = vmov 0.0   ;;  %vm59_vm1 = vcmask 261120  }
  0x27   :  { %663 = vmatprep.subr.bf16.mxu0 %v783_v0  ;;  %669 = vmatprep.subr.bf16.mxu1 %v783_v0  ;;  %v55_v2 = vld [vmem:[#allocation5] sm:$0xff]  ;;  %v56_v3 = vld [vmem:[#allocation5 + $0x8] sm:$0xff]  ;;  %v57_v6 = vld [vmem:[#allocation5 + $0x10] sm:$0xff]  ;;  %s786_s11 = smov [#allocation7]  }
  0x28   :  { %605 = vmatprep.mubr.msk.f32.mxu0 %vm784_vm0, %v785_v1  ;;  %616 = vmatprep.mubr.msk.f32.mxu1 %vm784_vm0, %v785_v1  ;;  %v64_v4 = vand.u32 4294901760, %v55_v2  ;;  %v67_v5 = vand.u32 4294901760, %v56_v3  ;;  %v58_v7 = vld [vmem:[#allocation5 + $0x18] sm:$0xff]  ;;  %v70_v9 = vand.u32 4294901760, %v57_v6  ;;  %s556_s12 = sshll.u32 %s786_s11, 4  ;;  %s557_s12 = int_to_ptr.vmem [resolvable:$true] %s556_s12 }
  0x29   :  { %v53_v8 = vld [vmem:[#allocation2] sm:$0xff]  ;;  %v73_v10 = vand.u32 4294901760, %v58_v7  ;;  %s751_s13 = scalar_lea.vmem %s557_s12, 128  ;;  %p756_p3 = scmp.lt.s32.totalorder %s557_s12, %s557_s12 }
  0x2a   :  { %v61_v11 = vsel %vm59_vm1, %v53_v8, 0  ;;  %v664_v12 = vpack.c.bf16 %v67_v5, %v64_v4  ;;  %v144_v13 = vsub.f32 %v55_v2, %v64_v4  ;;  %v151_v14 = vsub.f32 %v56_v3, %v67_v5  ;;  %v566_v55 = vld [vmem:[%s879_s2] ss:$0 sm:$0xff]  ;;  %p752_p2 = scmp.ne.s32.totalorder %s557_s12, %s751_s13  ;;  %p757_p4 = scmp.lt.s32.totalorder %s751_s13, %s751_s13 }
  0x2b   :  { %v132_v15 = vand.u32 4294901760, %v61_v11  ;;  %v158_v16 = vsub.f32 %v57_v6, %v70_v9  ;;  %v165_v17 = vsub.f32 %v58_v7, %v73_v10  ;;  %v667_v18 = vpack.c.bf16 %v73_v10, %v70_v9 }
  0x2c   :  { %665 = vmatpush3.bf16.msra.mxu0 %v664_v12  ;;  %v145_v19 = vand.u32 4294901760, %v144_v13  ;;  %v152_v20 = vand.u32 4294901760, %v151_v14  ;;  %v676_v32 = vpack.c.bf16 %v151_v14, %v144_v13  ;;  %p758_p5 = por %p757_p4, %p756_p3 }
  0x2d   :  { %v133_v21 = vsub.f32 %v61_v11, %v132_v15  ;;  %666 = vmatprep.subr.bf16.mxu0 %v783_v0  ;;  %v159_v22 = vand.u32 4294901760, %v158_v16  ;;  %v166_v23 = vand.u32 4294901760, %v165_v17  ;;  %v679_v38 = vpack.c.bf16 %v165_v17, %v158_v16 }
  0x2e   :  { %v146_v24 = vsub.f32 %v144_v13, %v145_v19  ;;  %v153_v25 = vsub.f32 %v151_v14, %v152_v20  ;;  %v688_v39 = vpack.c.bf16 %v152_v20, %v145_v19  ;;  %p759_p6 = pnand %p758_p5, %p752_p2 }
  0x2f   :  { %v134_v26 = vand.u32 4294901760, %v133_v21  ;;  %v160_v27 = vsub.f32 %v158_v16, %v159_v22  ;;  %v167_v28 = vsub.f32 %v165_v17, %v166_v23  ;;  %v691_v40 = vpack.c.bf16 %v166_v23, %v159_v22 }
  0x30   :  { %668 = vmatpush3.bf16.msra.mxu0 %v667_v18  ;;  %v147_v29 = vand.u32 4294901760, %v146_v24  ;;  %v154_v30 = vand.u32 4294901760, %v153_v25 }
  0x31   :  { %v135_v31 = vsub.f32 %v133_v21, %v134_v26  ;;  %675 = vmatprep.subr.bf16.mxu0 %v783_v0  ;;  %v161_v33 = vand.u32 4294901760, %v160_v27  ;;  %v168_v34 = vand.u32 4294901760, %v167_v28 }
  0x32   :  { %v670_v35 = vpack.c.bf16 %v154_v30, %v147_v29 }
  0x33   :  { %v136_v36 = vand.u32 4294901760, %v135_v31  ;;  %v673_v37 = vpack.c.bf16 %v168_v34, %v161_v33 }
  0x34   :  { %671 = vmatpush3.bf16.msra.mxu1 %v670_v35 }
  0x35   :  { %606 = vmatmul.mubr.f32.vlgmr.msra.gmra.mrb[0].mxu0 %v136_v36  ;;  %672 = vmatprep.subr.bf16.mxu1 %v783_v0 }
  0x36   :  { %677 = vmatpush3.bf16.msra.mxu0 %v676_v32  ;;  %627 = vmatprep.mubr.msk.f32.mxu0 %vm784_vm0, %v785_v1 }
  0x37   :  { %678 = vmatprep.subr.bf16.mxu0 %v783_v0 }
  0x38   :  { %674 = vmatpush3.bf16.msra.mxu1 %v673_v37 }
  0x39   :  { %681 = vmatprep.subr.bf16.mxu1 %v783_v0 }
  0x3a   :  { %680 = vmatpush3.bf16.msra.mxu0 %v679_v38 }
  0x3b   :  { %687 = vmatprep.subr.bf16.mxu0 %v783_v0  ;;  %617 = vmatmul.mubr.f32.vlgmr.msra.gmra.mrb[0].mxu1 %v132_v15 }
  0x3c   :  { %683 = vmatpush3.bf16.msra.mxu1 %v664_v12  ;;  %638 = vmatprep.mubr.msk.f32.mxu1 %vm784_vm0, %v785_v1 }
  0x3d   :  { %628 = vmatmul.mubr.f32.vlgmr.msra.gmra.mrb[2].mxu0 %v133_v21  ;;  %684 = vmatprep.subr.bf16.mxu1 %v783_v0 }
  0x3e   :  { %689 = vmatpush3.bf16.msra.mxu0 %v688_v39  ;;  %649 = vmatprep.mubr.msk.f32.mxu0 %vm784_vm0, %v785_v1 }
  0x3f   :  { %690 = vmatprep.subr.bf16.mxu0 %v783_v0 }
  0x40   :  { %686 = vmatpush3.bf16.msra.mxu1 %v667_v18 }
  0x41   :  { %693 = vmatprep.subr.bf16.mxu1 %v783_v0 }
  0x42   :  { %692 = vmatpush3.bf16.msra.mxu0 %v691_v40 }
  0x43   :  { %639 = vmatmul.mubr.f32.vlgmr.msra.gmra.mrb[2].mxu1 %v134_v26 }
  0x44   :  { %695 = vmatpush3.bf16.msra.mxu1 %v664_v12  ;;  %660 = vmatprep.mubr.msk.f32.mxu1 %vm784_vm0, %v785_v1 }
  0x45   :  { %650 = vmatmul.mubr.f32.vlgmr.msra.gmra.mrb[4].mxu0 %v132_v15  ;;  %696 = vmatprep.subr.bf16.mxu1 %v783_v0 }
  0x48   :  { %698 = vmatpush3.bf16.msra.mxu1 %v667_v18 }
  0x4b   :  { %661 = vmatmul.mubr.f32.vlgmr.msra.gmra.mrb[4].mxu1 %v132_v15 }
 0x108   :  { %v138_v41 = vpop.f32.mrb[0].mxu0 }
 0x109   :  { %v607_v42 = vpop.f32.mrb[1].mxu0 }
 0x10e   :  { %v229_v43 = vpop.f32.mrb[0].mxu1 }
 0x10f   :  { %v230_v44 = vadd.f32 %v229_v43, %v138_v41  ;;  %v618_v45 = vpop.f32.mrb[1].mxu1 }
 0x110   :  { %v309_v46 = vpop.f32.mrb[2].mxu0 }
 0x111   :  { %v629_v47 = vpop.f32.mrb[3].mxu0  ;;  %v310_v48 = vadd.f32 %v309_v46, %v230_v44 }
 0x116   :  { %v386_v49 = vpop.f32.mrb[2].mxu1 }
 0x117   :  { %v387_v50 = vadd.f32 %v386_v49, %v310_v48  ;;  %v640_v51 = vpop.f32.mrb[3].mxu1 }
 0x118   :  { %v469_v52 = vpop.f32.mrb[4].mxu0 }
 0x119   :  { %v651_v53 = vpop.f32.mrb[5].mxu0  ;;  %v470_v54 = vadd.f32 %v469_v52, %v387_v50 }
 0x11e   :  { %v544_v56 = vpop.f32.mrb[4].mxu1 }
 0x11f   :  { %v545_v57 = vadd.f32 %v544_v56, %v470_v54  ;;  %v662_v58 = vpop.f32.mrb[5].mxu1 }
 0x121   :  { %v548_v59 = vadd.f32 %v566_v55, %v545_v57 }
 0x123   :  { %549 = vst [vmem:[#allocation7] sm:$0xff] %v548_v59 }
 0x124   :  { %762 = shalt.err (!%p759_p6)
}
 0x125   :  { %s763_s16 = scalar_lea.hbm %s880_s3, 128 }
 0x126   :  { %p764_p7 = scmp.ne.s32.totalorder %s880_s3, %s763_s16  ;;  %p767_p8 = scmp.lt.u32.totalorder %s763_s16, %s880_s3 }
 0x128   :  { %p769_p9 = pnand %p767_p8, %p764_p7 }
 0x12a   :  { %772 = shalt.err (!%p769_p9)
}
 0x12b   :  { %559 = dma.vmem_to_hbm [thread:$0]  %s557_s12, 128, %s880_s3, [#allocation4]  }
 0x12c   :  { %777 = dma.done.wait [#allocation4], 128  }
 0x12d   :  { %778 = vsyncadd [#allocation4], 4294967168 }
 0x12e   :  { %563 = vsyncpa [#allocation3], 1 }
 0x12f   :  { %564 = vsyncpa [#allocation6], 1 }
 0x130   :  { %565 = vsyncpa [#allocation4], 1 }

</bundles_post_ra>
